<compile_context>
chip_gen: v7x
topology: tpu7x:2x2x1
jax: 0.10.0
libtpu: 0.0.40
codegen_flags: <defaults>
</compile_context>

<pallas_src>
import functools

import jax
import jax.numpy as jnp
from jax.experimental import pallas as pl
from jax.experimental.pallas import tpu as pltpu


# ----------------------------- fused Pallas kernel ---------------------------

def policy_fused_kernel(a_ref, wc_ref, bc_ref, wf_ref, bf_ref, wh_ref, bh_ref,
                        head_ref, logp_ref, fc_ref, *,
                        num_actions, img_h, batch_pad):
    hb = img_h * batch_pad                 # conv-GEMM M dim  (= 128 here)
    n_conv = wc_ref.shape[1]               # conv lanes per image row (= 128)

    # --- 3x3 conv (pad=1) as ONE MXU GEMM -----------------------------------
    # a_ref = Xrows[(h', b), (ci, w_in)] (zero-padded image rows).  The three
    # kh-shifted views are static, sublane-aligned slices; lane-concatenating
    # them gives the K = 3*128 LHS matching the per-kh blocked weight wc.
    x_band = jnp.concatenate(
        [a_ref[kh * batch_pad:kh * batch_pad + hb, :] for kh in range(3)],
        axis=-1)
    conv = jnp.dot(x_band.astype(jnp.bfloat16), wc_ref[...],
                   preferred_element_type=jnp.float32)
    conv = jnp.maximum(conv + bc_ref[...], 0.0)          # [H*BP, W*Cout] f32

    # --- FC encoder as ONE accumulating MXU GEMM ----------------------------
    # Gather the per-h conv tiles (rows h*BP .. h*BP+BP-1) into a lane-dense
    # [BP, H*W*Cout] slab via 16 static single-vreg stores, then contract the
    # whole K = 2048 in a single matmul (one MXU drain instead of 16).
    for h in range(img_h):
        fc_ref[:, h * n_conv:(h + 1) * n_conv] = conv[
            h * batch_pad:(h + 1) * batch_pad, :]
    feat = jnp.dot(fc_ref[...].astype(jnp.bfloat16), wf_ref[...],
                   preferred_element_type=jnp.float32)
    feat = jnp.maximum(feat + bf_ref[...], 0.0)          # [BP, F] f32 (F = 32)

    # --- fused policy + value head ------------------------------------------
    # logits in cols [0, A), value in col A: one lane-dense 128-wide store.
    head = jnp.dot(feat.astype(jnp.bfloat16), wh_ref[...],
                   preferred_element_type=jnp.float32) + bh_ref[...]
    head_ref[...] = head

    # Categorical(logits=...) log-softmax over the real action columns only
    # (padded columns + the value column masked out).  exp/log -> EUP slot.
    col = jax.lax.broadcasted_iota(jnp.int32, head.shape, 1)
    masked = jnp.where(col < num_actions, head, jnp.float32(-1e30))
    m = jnp.max(masked, axis=-1, keepdims=True)
    z = masked - m
    s = jnp.sum(jnp.exp(z), axis=-1, keepdims=True)
    logp_ref[...] = z - jnp.log(s)


# --------------------------------- JAX glue ----------------------------------

def _round_up(n, m):
    return ((n + m - 1) // m) * m


def policy_forward(x, params, num_actions):
    """Mirror of Policy.forward: returns (logits, log_probs, value)."""
    B, C, H, W = x.shape
    bp = max(8, _round_up(B, 8))              # pad batch to full f32 sublanes
    wp = W + 2
    k_blk = params["wc"].shape[0] // 3        # per-kh contraction block (=128)
    n_conv_pad = params["wc"].shape[1]
    n_head = params["wh"].shape[1]

    # Minimal im2col prologue (pad + one transpose + reshape + lane pad):
    # Xrows[(h', b), (ci, w_in)] = x_padded[b, ci, h', w_in]  (~1.07x input).
    # The 3-row bands are built in-kernel from static slices of this matrix.
    xp = jnp.pad(x, ((0, bp - B), (0, 0), (1, 1), (1, 1)))        # [bp,C,H+2,Wp]
    xr = xp.transpose(2, 0, 1, 3).reshape((H + 2) * bp, C * wp)   # rows (h', b)
    a = jnp.pad(xr, ((0, 0), (0, k_blk - C * wp)))                # f32 [(H+2)bp,128]

    # NOTE: for real (non-toy) batch sizes, add a batch-major grid axis with
    # dimension_semantics=("parallel",) and constant index_maps on the weights
    # so v7x's two TensorCores split the batch; at B=2 it would only add
    # overhead, so the kernel stays grid-less here.
    head, logp = pl.pallas_call(
        functools.partial(policy_fused_kernel, num_actions=num_actions,
                          img_h=H, batch_pad=bp),
        out_shape=(jax.ShapeDtypeStruct((bp, n_head), jnp.float32),
                   jax.ShapeDtypeStruct((bp, n_head), jnp.float32)),
        in_specs=[pl.BlockSpec(memory_space=pltpu.MemorySpace.VMEM)] * 7,
        out_specs=(pl.BlockSpec(memory_space=pltpu.MemorySpace.VMEM),
                   pl.BlockSpec(memory_space=pltpu.MemorySpace.VMEM)),
        scratch_shapes=[pltpu.VMEM((bp, H * n_conv_pad), jnp.float32)],
        compiler_params=pltpu.CompilerParams(vmem_limit_bytes=4 * 1024 * 1024),
    )(a, params["wc"], params["bc"], params["wf"], params["bf"],
      params["wh"], params["bh"])

    logits = head[:B, :num_actions]
    value = head[:B, num_actions]             # .squeeze(1) of the value head
    log_probs = logp[:B, :num_actions]
    return logits, log_probs, value


# ---------------------------- deterministic params ---------------------------

def make_params(key, cin, cout, H, W, feature_dim, num_actions):
    """Synthetic encoder + orthogonal heads, pre-folded into the kernel's GEMM
    layouts.  Returns (kernel_params, raw_params); raw_params feed the pure-JAX
    reference used for the parity check."""
    wp = W + 2
    k_blk = _round_up(cin * wp, 128)              # per-kh contraction block
    n_conv = W * cout
    n_conv_pad = _round_up(n_conv, 128)           # conv output lanes (= 128)
    n_head_pad = _round_up(num_actions + 1, 128)  # logits + value, lane-dense
    flat_dim = H * W * cout

    k0, k1, k2, k3, k4, k5 = jax.random.split(key, 6)
    ortho = jax.nn.initializers.orthogonal

    # conv weight in torch layout [Cout, Cin, 3, 3], folded offline into a
    # per-kh blocked GEMM weight:
    #   wc[kh*k_blk + ci*Wp + (w+kw), w*Cout + c] = w_conv[c, ci, kh, kw]
    # so concat_kh(Xrows[kh*bp : kh*bp + H*bp]) @ wc == conv(pad=1), output
    # columns ordered (w, c).
    w_conv = 0.1 * jax.random.normal(k0, (cout, cin, 3, 3), jnp.float32)
    b_conv = 0.05 * jax.random.normal(k1, (cout,), jnp.float32)
    wc = jnp.zeros((3 * k_blk, n_conv_pad), jnp.float32)
    w_idx = jnp.arange(W)
    c_idx = jnp.arange(cout)
    cols = w_idx[:, None] * cout + c_idx[None, :]
    for kh in range(3):
        for ci in range(cin):
            for kw in range(3):
                rows = kh * k_blk + ci * wp + w_idx + kw        # w_in = w + kw
                wc = wc.at[rows[:, None], cols].set(
                    jnp.broadcast_to(w_conv[:, ci, kh, kw][None, :], (W, cout)))
    bc = jnp.zeros((1, n_conv_pad), jnp.float32).at[0, :n_conv].set(
        jnp.tile(b_conv, W))

    # FC encoder weight, rows in (h, w, c) order so the kernel consumes the
    # conv tiles directly (torch's .flatten(1) uses (c, h, w) order: permute
    # rows accordingly when loading real torch weights).  Stored UNPADDED in
    # the feature dim — it is the largest DMA and `feat` is an intermediate.
    w_fc = (1.0 / jnp.sqrt(flat_dim)) * jax.random.normal(
        k2, (flat_dim, feature_dim), jnp.float32)
    b_fc = 0.05 * jax.random.normal(k3, (feature_dim,), jnp.float32)
    wf = jnp.zeros((H, n_conv_pad, feature_dim), jnp.float32)
    wf = wf.at[:, :n_conv, :].set(w_fc.reshape(H, n_conv, feature_dim))
    wf = wf.reshape(H * n_conv_pad, feature_dim)
    bf = b_fc[None, :]

    # heads: policy (orthogonal gain 0.01) and value (gain 1.0) fused into one
    # lane-dense matmul; zero bias (matches orthogonal_init on nn.Linear).
    w_pi = ortho(scale=0.01)(k4, (feature_dim, num_actions), jnp.float32)
    w_v = ortho(scale=1.0)(k5, (feature_dim, 1), jnp.float32)
    wh = jnp.zeros((feature_dim, n_head_pad), jnp.float32)
    wh = wh.at[:, :num_actions].set(w_pi)
    wh = wh.at[:, num_actions].set(w_v[:, 0])
    bh = jnp.zeros((1, n_head_pad), jnp.float32)

    params = dict(wc=wc.astype(jnp.bfloat16), bc=bc,
                  wf=wf.astype(jnp.bfloat16), bf=bf,
                  wh=wh.astype(jnp.bfloat16), bh=bh)
    raw = dict(w_conv=w_conv, b_conv=b_conv, w_fc=w_fc, b_fc=b_fc,
               w_pi=w_pi, w_v=w_v)
    return params, raw


def policy_reference(x, raw):
    """Pure-JAX f32 reference of the same synthetic Policy forward."""
    conv = jax.lax.conv_general_dilated(
        x, raw["w_conv"], window_strides=(1, 1), padding="SAME",
        dimension_numbers=("NCHW", "OIHW", "NCHW"))
    conv = jax.nn.relu(conv + raw["b_conv"][None, :, None, None])
    flat = conv.transpose(0, 2, 3, 1).reshape(x.shape[0], -1)   # (h, w, c) order
    feat = jax.nn.relu(flat @ raw["w_fc"] + raw["b_fc"])
    logits = feat @ raw["w_pi"]
    value = (feat @ raw["w_v"])[:, 0]
    return logits, jax.nn.log_softmax(logits, axis=-1), value


# ------------------------------------ main ------------------------------------

if __name__ == "__main__":
    B, C, H, W = 2, 4, 16, 16
    COUT, FEATURE_DIM, NUM_ACTIONS = 8, 32, 6

    key = jax.random.PRNGKey(0)
    kx, kp = jax.random.split(key)
    x = jax.random.normal(kx, (B, C, H, W), jnp.float32)     # NCHW screen input
    params, raw = make_params(kp, C, COUT, H, W, FEATURE_DIM, NUM_ACTIONS)

    fwd = jax.jit(functools.partial(policy_forward, num_actions=NUM_ACTIONS))
    logits, log_probs, value = fwd(x, params)
    jax.block_until_ready((logits, log_probs, value))

    assert logits.shape == (B, NUM_ACTIONS)
    assert log_probs.shape == (B, NUM_ACTIONS)
    assert value.shape == (B,)
    # masked log-softmax really normalizes over the A action columns
    psum = jnp.exp(log_probs).sum(axis=-1)
    assert bool(jnp.all(jnp.abs(psum - 1.0) < 1e-3))
    assert bool(jnp.all(jnp.isfinite(value)))
    # parity vs. pure-JAX f32 reference (bf16 MXU operands -> loose tolerances)
    r_logits, r_logp, r_value = policy_reference(x, raw)
    assert bool(jnp.max(jnp.abs(logits - r_logits)) < 1e-2)
    assert bool(jnp.max(jnp.abs(log_probs - r_logp)) < 1e-2)
    assert bool(jnp.max(jnp.abs(value - r_value)) < 1e-1)
    # TODO(synk): Categorical.sample() (the stochastic action draw in .act) is
    # left to the caller; the kernel returns the full normalized log-prob table.
    print("KERNEL_OK")
</pallas_src>

<mosaic_0001>
module attributes {stable_mosaic.version = 11 : i64} {
  func.func @policy_fused_kernel(%arg0: memref<144x128xf32, #tpu.memory_space<vmem>>, %arg1: memref<384x128xbf16, #tpu.memory_space<vmem>>, %arg2: memref<1x128xf32, #tpu.memory_space<vmem>>, %arg3: memref<2048x32xbf16, #tpu.memory_space<vmem>>, %arg4: memref<1x32xf32, #tpu.memory_space<vmem>>, %arg5: memref<32x128xbf16, #tpu.memory_space<vmem>>, %arg6: memref<1x128xf32, #tpu.memory_space<vmem>>, %arg7: memref<8x128xf32, #tpu.memory_space<vmem>>, %arg8: memref<8x128xf32, #tpu.memory_space<vmem>>, %arg9: memref<8x2048xf32, #tpu.memory_space<vmem>>) attributes {dimension_semantics = [], scalar_prefetch = 0 : i64, scratch_operands = 1 : i64, tpu.core_type = #tpu.core_type<tc>} {
    %c0 = arith.constant 0 : index
    %c0_0 = arith.constant 0 : index
    %0 = vector.load %arg0[%c0, %c0_0] : memref<144x128xf32, #tpu.memory_space<vmem>>, vector<128x128xf32>
    %c8 = arith.constant 8 : index
    %c0_1 = arith.constant 0 : index
    %1 = vector.load %arg0[%c8, %c0_1] : memref<144x128xf32, #tpu.memory_space<vmem>>, vector<128x128xf32>
    %c16 = arith.constant 16 : index
    %c0_2 = arith.constant 0 : index
    %2 = vector.load %arg0[%c16, %c0_2] : memref<144x128xf32, #tpu.memory_space<vmem>>, vector<128x128xf32>
    %3 = tpu.concatenate %0, %1, %2 in 1 : vector<128x128xf32>, vector<128x128xf32>, vector<128x128xf32> -> vector<128x384xf32>
    %4 = arith.truncf %3 : vector<128x384xf32> to vector<128x384xbf16>
    %c0_3 = arith.constant 0 : index
    %c0_4 = arith.constant 0 : index
    %5 = vector.load %arg1[%c0_3, %c0_4] : memref<384x128xbf16, #tpu.memory_space<vmem>>, vector<384x128xbf16>
    %cst = arith.constant dense<0.000000e+00> : vector<128x128xf32>
    %6 = tpu.matmul %4, %5, %cst {dimension_numbers = #tpu.dot_dimension_numbers<[1], [0], [0], [1], [0, 0, 1, 1], [], []>} : vector<128x384xbf16>, vector<384x128xbf16>, vector<128x128xf32> -> vector<128x128xf32>
    %c0_5 = arith.constant 0 : index
    %c0_6 = arith.constant 0 : index
    %7 = vector.load %arg2[%c0_5, %c0_6] : memref<1x128xf32, #tpu.memory_space<vmem>>, vector<1x128xf32>
    %8 = vector.broadcast %7 : vector<1x128xf32> to vector<128x128xf32>
    %9 = arith.addf %6, %8 : vector<128x128xf32>
    %cst_7 = arith.constant 0.000000e+00 : f32
    %10 = vector.broadcast %cst_7 : f32 to vector<128x128xf32>
    %11 = arith.maximumf %9, %10 : vector<128x128xf32>
    %12 = vector.extract_strided_slice %11 {offsets = [0, 0], sizes = [8, 128], strides = [1, 1]} : vector<128x128xf32> to vector<8x128xf32>
    %c0_8 = arith.constant 0 : index
    %c0_9 = arith.constant 0 : index
    %13 = vector.load %arg9[%c0_8, %c0_9] : memref<8x2048xf32, #tpu.memory_space<vmem>>, vector<8x128xf32>
    tpu.vector_store %arg9[%c0_8, %c0_9], %12 {strides = array<i32>} : memref<8x2048xf32, #tpu.memory_space<vmem>>, vector<8x128xf32>,
    %14 = vector.extract_strided_slice %11 {offsets = [8, 0], sizes = [8, 128], strides = [1, 1]} : vector<128x128xf32> to vector<8x128xf32>
    %c0_10 = arith.constant 0 : index
    %c128 = arith.constant 128 : index
    %15 = vector.load %arg9[%c0_10, %c128] : memref<8x2048xf32, #tpu.memory_space<vmem>>, vector<8x128xf32>
    tpu.vector_store %arg9[%c0_10, %c128], %14 {strides = array<i32>} : memref<8x2048xf32, #tpu.memory_space<vmem>>, vector<8x128xf32>,
    %16 = vector.extract_strided_slice %11 {offsets = [16, 0], sizes = [8, 128], strides = [1, 1]} : vector<128x128xf32> to vector<8x128xf32>
    %c0_11 = arith.constant 0 : index
    %c256 = arith.constant 256 : index
    %17 = vector.load %arg9[%c0_11, %c256] : memref<8x2048xf32, #tpu.memory_space<vmem>>, vector<8x128xf32>
    tpu.vector_store %arg9[%c0_11, %c256], %16 {strides = array<i32>} : memref<8x2048xf32, #tpu.memory_space<vmem>>, vector<8x128xf32>,
    %18 = vector.extract_strided_slice %11 {offsets = [24, 0], sizes = [8, 128], strides = [1, 1]} : vector<128x128xf32> to vector<8x128xf32>
    %c0_12 = arith.constant 0 : index
    %c384 = arith.constant 384 : index
    %19 = vector.load %arg9[%c0_12, %c384] : memref<8x2048xf32, #tpu.memory_space<vmem>>, vector<8x128xf32>
    tpu.vector_store %arg9[%c0_12, %c384], %18 {strides = array<i32>} : memref<8x2048xf32, #tpu.memory_space<vmem>>, vector<8x128xf32>,
    %20 = vector.extract_strided_slice %11 {offsets = [32, 0], sizes = [8, 128], strides = [1, 1]} : vector<128x128xf32> to vector<8x128xf32>
    %c0_13 = arith.constant 0 : index
    %c512 = arith.constant 512 : index
    %21 = vector.load %arg9[%c0_13, %c512] : memref<8x2048xf32, #tpu.memory_space<vmem>>, vector<8x128xf32>
    tpu.vector_store %arg9[%c0_13, %c512], %20 {strides = array<i32>} : memref<8x2048xf32, #tpu.memory_space<vmem>>, vector<8x128xf32>,
    %22 = vector.extract_strided_slice %11 {offsets = [40, 0], sizes = [8, 128], strides = [1, 1]} : vector<128x128xf32> to vector<8x128xf32>
    %c0_14 = arith.constant 0 : index
    %c640 = arith.constant 640 : index
    %23 = vector.load %arg9[%c0_14, %c640] : memref<8x2048xf32, #tpu.memory_space<vmem>>, vector<8x128xf32>
    tpu.vector_store %arg9[%c0_14, %c640], %22 {strides = array<i32>} : memref<8x2048xf32, #tpu.memory_space<vmem>>, vector<8x128xf32>,
    %24 = vector.extract_strided_slice %11 {offsets = [48, 0], sizes = [8, 128], strides = [1, 1]} : vector<128x128xf32> to vector<8x128xf32>
    %c0_15 = arith.constant 0 : index
    %c768 = arith.constant 768 : index
    %25 = vector.load %arg9[%c0_15, %c768] : memref<8x2048xf32, #tpu.memory_space<vmem>>, vector<8x128xf32>
    tpu.vector_store %arg9[%c0_15, %c768], %24 {strides = array<i32>} : memref<8x2048xf32, #tpu.memory_space<vmem>>, vector<8x128xf32>,
    %26 = vector.extract_strided_slice %11 {offsets = [56, 0], sizes = [8, 128], strides = [1, 1]} : vector<128x128xf32> to vector<8x128xf32>
    %c0_16 = arith.constant 0 : index
    %c896 = arith.constant 896 : index
    %27 = vector.load %arg9[%c0_16, %c896] : memref<8x2048xf32, #tpu.memory_space<vmem>>, vector<8x128xf32>
    tpu.vector_store %arg9[%c0_16, %c896], %26 {strides = array<i32>} : memref<8x2048xf32, #tpu.memory_space<vmem>>, vector<8x128xf32>,
    %28 = vector.extract_strided_slice %11 {offsets = [64, 0], sizes = [8, 128], strides = [1, 1]} : vector<128x128xf32> to vector<8x128xf32>
    %c0_17 = arith.constant 0 : index
    %c1024 = arith.constant 1024 : index
    %29 = vector.load %arg9[%c0_17, %c1024] : memref<8x2048xf32, #tpu.memory_space<vmem>>, vector<8x128xf32>
    tpu.vector_store %arg9[%c0_17, %c1024], %28 {strides = array<i32>} : memref<8x2048xf32, #tpu.memory_space<vmem>>, vector<8x128xf32>,
    %30 = vector.extract_strided_slice %11 {offsets = [72, 0], sizes = [8, 128], strides = [1, 1]} : vector<128x128xf32> to vector<8x128xf32>
    %c0_18 = arith.constant 0 : index
    %c1152 = arith.constant 1152 : index
    %31 = vector.load %arg9[%c0_18, %c1152] : memref<8x2048xf32, #tpu.memory_space<vmem>>, vector<8x128xf32>
    tpu.vector_store %arg9[%c0_18, %c1152], %30 {strides = array<i32>} : memref<8x2048xf32, #tpu.memory_space<vmem>>, vector<8x128xf32>,
    %32 = vector.extract_strided_slice %11 {offsets = [80, 0], sizes = [8, 128], strides = [1, 1]} : vector<128x128xf32> to vector<8x128xf32>
    %c0_19 = arith.constant 0 : index
    %c1280 = arith.constant 1280 : index
    %33 = vector.load %arg9[%c0_19, %c1280] : memref<8x2048xf32, #tpu.memory_space<vmem>>, vector<8x128xf32>
    tpu.vector_store %arg9[%c0_19, %c1280], %32 {strides = array<i32>} : memref<8x2048xf32, #tpu.memory_space<vmem>>, vector<8x128xf32>,
    %34 = vector.extract_strided_slice %11 {offsets = [88, 0], sizes = [8, 128], strides = [1, 1]} : vector<128x128xf32> to vector<8x128xf32>
    %c0_20 = arith.constant 0 : index
    %c1408 = arith.constant 1408 : index
    %35 = vector.load %arg9[%c0_20, %c1408] : memref<8x2048xf32, #tpu.memory_space<vmem>>, vector<8x128xf32>
    tpu.vector_store %arg9[%c0_20, %c1408], %34 {strides = array<i32>} : memref<8x2048xf32, #tpu.memory_space<vmem>>, vector<8x128xf32>,
    %36 = vector.extract_strided_slice %11 {offsets = [96, 0], sizes = [8, 128], strides = [1, 1]} : vector<128x128xf32> to vector<8x128xf32>
    %c0_21 = arith.constant 0 : index
    %c1536 = arith.constant 1536 : index
    %37 = vector.load %arg9[%c0_21, %c1536] : memref<8x2048xf32, #tpu.memory_space<vmem>>, vector<8x128xf32>
    tpu.vector_store %arg9[%c0_21, %c1536], %36 {strides = array<i32>} : memref<8x2048xf32, #tpu.memory_space<vmem>>, vector<8x128xf32>,
    %38 = vector.extract_strided_slice %11 {offsets = [104, 0], sizes = [8, 128], strides = [1, 1]} : vector<128x128xf32> to vector<8x128xf32>
    %c0_22 = arith.constant 0 : index
    %c1664 = arith.constant 1664 : index
    %39 = vector.load %arg9[%c0_22, %c1664] : memref<8x2048xf32, #tpu.memory_space<vmem>>, vector<8x128xf32>
    tpu.vector_store %arg9[%c0_22, %c1664], %38 {strides = array<i32>} : memref<8x2048xf32, #tpu.memory_space<vmem>>, vector<8x128xf32>,
    %40 = vector.extract_strided_slice %11 {offsets = [112, 0], sizes = [8, 128], strides = [1, 1]} : vector<128x128xf32> to vector<8x128xf32>
    %c0_23 = arith.constant 0 : index
    %c1792 = arith.constant 1792 : index
    %41 = vector.load %arg9[%c0_23, %c1792] : memref<8x2048xf32, #tpu.memory_space<vmem>>, vector<8x128xf32>
    tpu.vector_store %arg9[%c0_23, %c1792], %40 {strides = array<i32>} : memref<8x2048xf32, #tpu.memory_space<vmem>>, vector<8x128xf32>,
    %42 = vector.extract_strided_slice %11 {offsets = [120, 0], sizes = [8, 128], strides = [1, 1]} : vector<128x128xf32> to vector<8x128xf32>
    %c0_24 = arith.constant 0 : index
    %c1920 = arith.constant 1920 : index
    %43 = vector.load %arg9[%c0_24, %c1920] : memref<8x2048xf32, #tpu.memory_space<vmem>>, vector<8x128xf32>
    tpu.vector_store %arg9[%c0_24, %c1920], %42 {strides = array<i32>} : memref<8x2048xf32, #tpu.memory_space<vmem>>, vector<8x128xf32>,
    %c0_25 = arith.constant 0 : index
    %c0_26 = arith.constant 0 : index
    %44 = vector.load %arg9[%c0_25, %c0_26] : memref<8x2048xf32, #tpu.memory_space<vmem>>, vector<8x2048xf32>
    %45 = arith.truncf %44 : vector<8x2048xf32> to vector<8x2048xbf16>
    %c0_27 = arith.constant 0 : index
    %c0_28 = arith.constant 0 : index
    %46 = vector.load %arg3[%c0_27, %c0_28] : memref<2048x32xbf16, #tpu.memory_space<vmem>>, vector<2048x32xbf16>
    %cst_29 = arith.constant dense<0.000000e+00> : vector<8x32xf32>
    %47 = tpu.matmul %45, %46, %cst_29 {dimension_numbers = #tpu.dot_dimension_numbers<[1], [0], [0], [1], [0, 0, 1, 1], [], []>} : vector<8x2048xbf16>, vector<2048x32xbf16>, vector<8x32xf32> -> vector<8x32xf32>
    %c0_30 = arith.constant 0 : index
    %c0_31 = arith.constant 0 : index
    %48 = vector.load %arg4[%c0_30, %c0_31] : memref<1x32xf32, #tpu.memory_space<vmem>>, vector<1x32xf32>
    %49 = vector.broadcast %48 : vector<1x32xf32> to vector<8x32xf32>
    %50 = arith.addf %47, %49 : vector<8x32xf32>
    %cst_32 = arith.constant 0.000000e+00 : f32
    %51 = vector.broadcast %cst_32 : f32 to vector<8x32xf32>
    %52 = arith.maximumf %50, %51 : vector<8x32xf32>
    %53 = arith.truncf %52 : vector<8x32xf32> to vector<8x32xbf16>
    %c0_33 = arith.constant 0 : index
    %c0_34 = arith.constant 0 : index
    %54 = vector.load %arg5[%c0_33, %c0_34] : memref<32x128xbf16, #tpu.memory_space<vmem>>, vector<32x128xbf16>
    %cst_35 = arith.constant dense<0.000000e+00> : vector<8x128xf32>
    %55 = tpu.matmul %53, %54, %cst_35 {dimension_numbers = #tpu.dot_dimension_numbers<[1], [0], [0], [1], [0, 0, 1, 1], [], []>} : vector<8x32xbf16>, vector<32x128xbf16>, vector<8x128xf32> -> vector<8x128xf32>
    %c0_36 = arith.constant 0 : index
    %c0_37 = arith.constant 0 : index
    %56 = vector.load %arg6[%c0_36, %c0_37] : memref<1x128xf32, #tpu.memory_space<vmem>>, vector<1x128xf32>
    %57 = vector.broadcast %56 : vector<1x128xf32> to vector<8x128xf32>
    %58 = arith.addf %55, %57 : vector<8x128xf32>
    %c0_38 = arith.constant 0 : index
    %c0_39 = arith.constant 0 : index
    %59 = vector.load %arg7[%c0_38, %c0_39] : memref<8x128xf32, #tpu.memory_space<vmem>>, vector<8x128xf32>
    tpu.vector_store %arg7[%c0_38, %c0_39], %58 {strides = array<i32>} : memref<8x128xf32, #tpu.memory_space<vmem>>, vector<8x128xf32>,
    %60 = tpu.iota {dimensions = array<i32: 1>} : vector<8x128xi32>
    %c6_i32 = arith.constant 6 : i32
    %61 = vector.broadcast %c6_i32 : i32 to vector<8x128xi32>
    %62 = arith.cmpi slt, %60, %61 : vector<8x128xi32>
    %cst_40 = arith.constant -1.000000e+30 : f32
    %63 = vector.broadcast %cst_40 : f32 to vector<8x128xf32>
    %64 = arith.select %62, %58, %63 : vector<8x128xi1>, vector<8x128xf32>
    %cst_41 = arith.constant dense<0xFF800000> : vector<8xf32>
    %65 = vector.multi_reduction <maximumf>, %64, %cst_41 [1] : vector<8x128xf32> to vector<8xf32>
    %66 = vector.shape_cast %65 : vector<8xf32> to vector<8x1xf32>
    %67 = vector.broadcast %66 : vector<8x1xf32> to vector<8x128xf32>
    %68 = arith.subf %64, %67 : vector<8x128xf32>
    %69 = math.exp %68 : vector<8x128xf32>
    %cst_42 = arith.constant dense<0.000000e+00> : vector<8xf32>
    %70 = vector.multi_reduction <add>, %69, %cst_42 [1] : vector<8x128xf32> to vector<8xf32>
    %71 = vector.shape_cast %70 : vector<8xf32> to vector<8x1xf32>
    %72 = math.log %71 : vector<8x1xf32>
    %73 = vector.broadcast %72 : vector<8x1xf32> to vector<8x128xf32>
    %74 = arith.subf %68, %73 : vector<8x128xf32>
    %c0_43 = arith.constant 0 : index
    %c0_44 = arith.constant 0 : index
    %75 = vector.load %arg8[%c0_43, %c0_44] : memref<8x128xf32, #tpu.memory_space<vmem>>, vector<8x128xf32>
    tpu.vector_store %arg8[%c0_43, %c0_44], %74 {strides = array<i32>} : memref<8x128xf32, #tpu.memory_space<vmem>>, vector<8x128xf32>,
    return
  }
}

</mosaic_0001>

<bundles_post_ra>
// kernel: policy_forward.1
= control target key start
LH: loop header
LB: loop body
LE: loop exit
PB: predicated region body
PF: predicated region fallthrough
CT: control target
= control target key end

     0   :  { %vm2605_vm0 = vmmov 0   ;;  %vm1919_vm1 = vcmask 261120   ;;  %s3264_s1 = inlined_call_operand.vmem [shape: bf16[384,128], index: 1, kind: input, shape index: {}]   ;;  %s3265_s0 = inlined_call_operand.vmem [shape: f32[144,128], index: 0, kind: input, shape index: {}]   ;;  %s3266_s3 = inlined_call_operand.vmem [shape: bf16[2048,32], index: 3, kind: input, shape index: {}]   ;;  %s3267_s2 = inlined_call_operand.vmem [shape: f32[1,128], index: 2, kind: input, shape index: {}]   ;;  %s3268_s5 = inlined_call_operand.vmem [shape: bf16[32,128], index: 5, kind: input, shape index: {}]   ;;  %s3269_s4 = inlined_call_operand.vmem [shape: f32[1,32], index: 4, kind: input, shape index: {}]   ;;  %s3270_s6 = inlined_call_operand.vmem [shape: f32[1,128], index: 6, kind: input, shape index: {}]   ;;  %s3271_s7 = inlined_call_operand.vmem [shape: f32[8,128], index: 7, kind: output, shape index: {0}]   ;;  %s3272_s8 = inlined_call_operand.vmem [shape: f32[8,128], index: 8, kind: output, shape index: {1}]  }
   0x1   :  { %v2446_v0 = vld [vmem:[%s3264_s1 + $0x40] sm:$0xff]   ;;  %v2448_v2 = vld [vmem:[%s3264_s1 + $0x48] sm:$0xff]   ;;  %v2451_v5 = vld [vmem:[%s3264_s1 + $0x50] sm:$0xff]  }
   0x2   :  { %v2447_v1 = vld [vmem:[%s3264_s1] sm:$0xff]   ;;  %2145 = vmatprep.subr.bf16.mxu0 %v2446_v0  ;;  %v2450_v4 = vld [vmem:[%s3264_s1 + $0x8] sm:$0xff]   ;;  %v2453_v7 = vld [vmem:[%s3264_s1 + $0x10] sm:$0xff]  }
   0x3   :  { %2146 = vmatpush3.bf16.msra.mxu0 %v2447_v1  ;;  %v2449_v3 = vld [vmem:[%s3264_s1 + $0x80] sm:$0xff]   ;;  %v2452_v6 = vld [vmem:[%s3264_s1 + $0x88] sm:$0xff]   ;;  %v2454_v8 = vld [vmem:[%s3264_s1 + $0x58] sm:$0xff]  }
   0x4   :  { %2147 = vmatprep.subr.bf16.mxu0 %v2448_v2  ;;  %2404 = vmatprep.subr.bf16.mxu1 %v2449_v3  ;;  %v2455_v9 = vld [vmem:[%s3264_s1 + $0x90] sm:$0xff]   ;;  %v2456_v10 = vld [vmem:[%s3264_s1 + $0x18] sm:$0xff]   ;;  %v2457_v11 = vld [vmem:[%s3264_s1 + $0x60] sm:$0xff]  }
   0x5   :  { %2405 = vmatpush3.bf16.msra.mxu1 %v2449_v3  ;;  %v2458_v12 = vld [vmem:[%s3264_s1 + $0x98] sm:$0xff]   ;;  %v2459_v13 = vld [vmem:[%s3264_s1 + $0x20] sm:$0xff]   ;;  %v2460_v15 = vld [vmem:[%s3264_s1 + $0x68] sm:$0xff]  }
   0x6   :  { %2406 = vmatprep.subr.bf16.mxu1 %v2452_v6  ;;  %v2461_v14 = vld [vmem:[%s3264_s1 + $0xa0] sm:$0xff]   ;;  %v2462_v16 = vld [vmem:[%s3264_s1 + $0x28] sm:$0xff]   ;;  %v2463_v18 = vld [vmem:[%s3264_s1 + $0x70] sm:$0xff]  }
   0x7   :  { %2148 = vmatpush3.bf16.msra.mxu0 %v2450_v4  ;;  %v2464_v17 = vld [vmem:[%s3264_s1 + $0xa8] sm:$0xff]   ;;  %v2465_v19 = vld [vmem:[%s3264_s1 + $0x30] sm:$0xff]   ;;  %v2466_v20 = vld [vmem:[%s3264_s1 + $0x78] sm:$0xff]  }
   0x8   :  { %2149 = vmatprep.subr.bf16.mxu0 %v2451_v5  ;;  %v2467_v21 = vld [vmem:[%s3264_s1 + $0xb0] sm:$0xff]   ;;  %v30_v22 = vld [vmem:[%s3265_s0 + $0x8] sm:$0xff]  ;;  %v32_v24 = vld [vmem:[%s3265_s0 + $0x18] sm:$0xff] }
   0x9   :  { %2407 = vmatpush3.bf16.msra.mxu1 %v2452_v6  ;;  %v31_v23 = vld [vmem:[%s3265_s0 + $0x10] sm:$0xff]  ;;  %v2468_v27 = vld [vmem:[%s3264_s1 + $0x38] sm:$0xff]   ;;  %v29_v28 = vld [vmem:[%s3265_s0] sm:$0xff] }
   0xa   :  { %2408 = vmatprep.subr.bf16.mxu1 %v2455_v9  ;;  %v63_v25 = vpack.c.bf16 %v31_v23, %v30_v22  ;;  %v65_v26 = vpack.c.bf16 %v32_v24, %v31_v23  ;;  %v2469_v29 = vld [vmem:[%s3264_s1 + $0xb8] sm:$0xff]   ;;  %v48_v30 = vld [vmem:[%s3265_s0 + $0x20] sm:$0xff]  ;;  %v49_v31 = vld [vmem:[%s3265_s0 + $0x28] sm:$0xff]  ;;  %v62_v33 = vpack.c.bf16 %v30_v22, %v29_v28 }
   0xb   :  { %2150 = vmatpush3.bf16.msra.mxu0 %v2453_v7  ;;  %v2744_v32 = vld [vmem:[%s3265_s0 + $0x38] sm:$0xff]  ;;  %v2470_v34 = vld [vmem:[%s3266_s3 + $0xc0] sm:$0xff]   ;;  %v66_v35 = vpack.c.bf16 %v48_v30, %v32_v24  ;;  %v2472_v37 = vld [vmem:[%s3266_s3 + $0xc8] sm:$0xff]   ;;  %v67_v38 = vpack.c.bf16 %v49_v31, %v48_v30 }
   0xc   :  { %2151 = vmatprep.subr.bf16.mxu0 %v2454_v8  ;;  %317 = vmatprep.mubr.bf16.mxu0 %v63_v25  ;;  %v2471_v36 = vld [vmem:[%s3266_s3 + $0x80] sm:$0xff]   ;;  %v35_v39 = vld [vmem:[%s3265_s0 + $0x30] sm:$0xff]  ;;  %v2473_v41 = vld [vmem:[%s3266_s3 + $0x88] sm:$0xff]  }
   0xd   :  { %2409 = vmatpush3.bf16.msra.mxu1 %v2455_v9  ;;  %2420 = vmatprep.mubr.bf16.mxu1 %v65_v26  ;;  %v2759_v40 = vpack.c.bf16 %v2744_v32, %v35_v39  ;;  %v2474_v42 = vld [vmem:[%s3266_s3 + $0xd0] sm:$0xff]   ;;  %v52_v43 = vld [vmem:[%s3265_s0 + $0x40] sm:$0xff]  ;;  %v2773_v44 = vld [vmem:[%s3265_s0 + $0x48] sm:$0xff]  ;;  %v69_v49 = vpack.c.bf16 %v35_v39, %v49_v31 }
   0xe   :  { %2410 = vmatprep.subr.bf16.mxu1 %v2458_v12  ;;  %v2476_v45 = vld [vmem:[%s3266_s3 + $0x40] sm:$0xff]   ;;  %v2781_v46 = vld [vmem:[%s3265_s0 + $0x58] sm:$0xff]  ;;  %v2475_v47 = vld [vmem:[%s3266_s3 + $0x90] sm:$0xff]   ;;  %v73_v53 = vpack.c.bf16 %v2773_v44, %v52_v43  ;;  %v72_v1 = vpack.c.bf16 %v52_v43, %v2744_v32 }
   0xf   :  { %2152 = vmatpush3.bf16.msra.mxu0 %v2456_v10  ;;  %v2478_v48 = vld [vmem:[%s3266_s3] sm:$0xff]   ;;  %v39_v50 = vld [vmem:[%s3265_s0 + $0x50] sm:$0xff]  ;;  %v2477_v51 = vld [vmem:[%s3266_s3 + $0xd8] sm:$0xff]  }
  0x10   :  { %2153 = vmatprep.subr.bf16.mxu0 %v2457_v11  ;;  %v2480_v52 = vld [vmem:[%s3266_s3 + $0x48] sm:$0xff]   ;;  %v2479_v54 = vld [vmem:[%s3266_s3 + $0x98] sm:$0xff]   ;;  %v76_v56 = vpack.c.bf16 %v2781_v46, %v39_v50  ;;  %v2482_v57 = vld [vmem:[%s3266_s3 + $0x50] sm:$0xff]  }
  0x11   :  { %2411 = vmatpush3.bf16.msra.mxu1 %v2458_v12  ;;  %v2481_v55 = vld [vmem:[%s3266_s3 + $0x8] sm:$0xff]   ;;  %v2483_v58 = vld [vmem:[%s3266_s3 + $0xe0] sm:$0xff]   ;;  %v2484_v61 = vld [vmem:[%s3266_s3 + $0x10] sm:$0xff]   ;;  %v75_v12 = vpack.c.bf16 %v39_v50, %v2773_v44 }
  0x12   :  { %2412 = vmatprep.subr.bf16.mxu1 %v2461_v14  ;;  %v56_v59 = vld [vmem:[%s3265_s0 + $0x60] sm:$0xff]  ;;  %v57_v60 = vld [vmem:[%s3265_s0 + $0x68] sm:$0xff]  ;;  %v59_v62 = vld [vmem:[%s3265_s0 + $0x78] sm:$0xff] }
  0x13   :  { %2154 = vmatpush3.bf16.msra.mxu0 %v2459_v13  ;;  %v2485_v63 = vld [vmem:[%s3266_s3 + $0xa0] sm:$0xff]   ;;  %v2486_v0 = vld [vmem:[%s3266_s3 + $0x58] sm:$0xff]   ;;  %v43_v2 = vld [vmem:[%s3265_s0 + $0x70] sm:$0xff]  ;;  %v79_v5 = vpack.c.bf16 %v57_v60, %v56_v59 }
  0x14   :  { %2155 = vmatprep.subr.bf16.mxu0 %v2460_v15  ;;  %v2487_v3 = vld [vmem:[%s3266_s3 + $0x18] sm:$0xff]   ;;  %v2488_v4 = vld [vmem:[%s3266_s3 + $0x60] sm:$0xff]   ;;  %v2489_v6 = vld [vmem:[%s3266_s3 + $0xe8] sm:$0xff]   ;;  %v82_v7 = vpack.c.bf16 %v59_v62, %v43_v2  ;;  %v81_v15 = vpack.c.bf16 %v43_v2, %v57_v60 }
  0x15   :  { %2413 = vmatpush3.bf16.msra.mxu1 %v2461_v14  ;;  %v2490_v8 = vld [vmem:[%s3266_s3 + $0x20] sm:$0xff]   ;;  %v2491_v9 = vld [vmem:[%s3266_s3 + $0xa8] sm:$0xff]   ;;  %v78_v14 = vpack.c.bf16 %v56_v59, %v2781_v46  ;;  %v2499_v22 = vld [vmem:[%s3266_s3 + $0x38] sm:$0xff]  }
  0x16   :  { %2414 = vmatprep.subr.bf16.mxu1 %v2464_v17  ;;  %v60_v10 = vld [vmem:[%s3265_s0 + $0x80] sm:$0xff]  ;;  %v61_v11 = vld [vmem:[%s3265_s0 + $0x88] sm:$0xff]  ;;  %v2495_v23 = vld [vmem:[%s3266_s3 + $0xf0] sm:$0xff]  }
  0x17   :  { %2156 = vmatpush3.bf16.msra.mxu0 %v2462_v16  ;;  %v85_v13 = vpack.c.bf16 %v61_v11, %v60_v10  ;;  %v84_v16 = vpack.c.bf16 %v60_v10, %v59_v62  ;;  %v2497_v24 = vld [vmem:[%s3266_s3 + $0xb0] sm:$0xff]   ;;  %v2501_v25 = vld [vmem:[%s3266_s3 + $0x140] sm:$0xff]  }
  0x18   :  { %2157 = vmatprep.subr.bf16.mxu0 %v2463_v18  ;;  %v2493_v18 = vld [vmem:[%s3266_s3 + $0x28] sm:$0xff]   ;;  %v2507_v28 = vld [vmem:[%s3266_s3 + $0x1c0] sm:$0xff]   ;;  %v2508_v11 = vld [vmem:[%s3266_s3 + $0x110] sm:$0xff]  }
  0x19   :  { %2415 = vmatpush3.bf16.msra.mxu1 %v2464_v17  ;;  %v2492_v17 = vld [vmem:[%s3266_s3 + $0x68] sm:$0xff]   ;;  %v2898_v31 = vld [vmem:[%s3267_s2] ss:$0 sm:$0xff] }
  0x1a   :  { %2416 = vmatprep.subr.bf16.mxu1 %v2467_v21 }
  0x1b   :  { %2158 = vmatpush3.bf16.msra.mxu0 %v2465_v19  ;;  %v2494_v19 = vld [vmem:[%s3266_s3 + $0x70] sm:$0xff]  }
  0x1c   :  { %2159 = vmatprep.subr.bf16.mxu0 %v2466_v20  ;;  %v2496_v20 = vld [vmem:[%s3266_s3 + $0x30] sm:$0xff]  }
  0x1d   :  { %2417 = vmatpush3.bf16.msra.mxu1 %v2467_v21  ;;  %v2498_v21 = vld [vmem:[%s3266_s3 + $0x78] sm:$0xff]  }
  0x1e   :  { %2418 = vmatprep.subr.bf16.mxu1 %v2469_v29 }
  0x1f   :  { %2160 = vmatpush3.bf16.msra.mxu0 %v2468_v27  ;;  %v2502_v27 = vld [vmem:[%s3266_s3 + $0xb8] sm:$0xff]  }
  0x20   :  { %2247 = vmatprep.subr.bf16.mxu0 %v2470_v34 }
  0x21   :  { %2419 = vmatpush3.bf16.msra.mxu1 %v2469_v29 }
  0x22   :  { %318 = vmatmul.mubr.bf16.vlgmr.msra.gmra.mrb[0].mxu0 %v62_v33  ;;  %2225 = vmatprep.subr.bf16.mxu1 %v2476_v45 }
  0x23   :  { %325 = vmatprep.mubr.bf16.mxu0 %v66_v35  ;;  %2248 = vmatpush3.bf16.msra.mxu0 %v2471_v36 }
  0x24   :  { %2249 = vmatprep.subr.bf16.mxu0 %v2472_v37  ;;  %2421 = vmatmul.mubr.bf16.vlgmr.msra.gmra.mrb[0].mxu1 %v67_v38 }
  0x25   :  { %2424 = vmatprep.mubr.bf16.mxu1 %v2759_v40  ;;  %2226 = vmatpush3.bf16.msra.mxu1 %v2478_v48 }
  0x26   :  { %2227 = vmatprep.subr.bf16.mxu1 %v2480_v52 }
  0x27   :  { %2250 = vmatpush3.bf16.msra.mxu0 %v2473_v41 }
  0x28   :  { %2251 = vmatprep.subr.bf16.mxu0 %v2474_v42 }
  0x29   :  { %2228 = vmatpush3.bf16.msra.mxu1 %v2481_v55  ;;  %v2503_v55 = vld [vmem:[%s3266_s3 + $0x100] sm:$0xff]  }
  0x2a   :  { %326 = vmatmul.mubr.bf16.gmra.mrb[4].mxu0 %v65_v26  ;;  %2229 = vmatprep.subr.bf16.mxu1 %v2482_v57  ;;  %v2500_v26 = vld [vmem:[%s3266_s3 + $0xf8] sm:$0xff]  }
  0x2b   :  { %333 = vmatprep.mubr.bf16.mxu0 %v69_v49  ;;  %2252 = vmatpush3.bf16.msra.mxu0 %v2475_v47 }
  0x2c   :  { %2253 = vmatprep.subr.bf16.mxu0 %v2477_v51  ;;  %2425 = vmatmul.mubr.bf16.gmra.mrb[4].mxu1 %v73_v53 }
  0x2d   :  { %2428 = vmatprep.mubr.bf16.mxu1 %v76_v56  ;;  %2230 = vmatpush3.bf16.msra.mxu1 %v2484_v61 }
  0x2e   :  { %2231 = vmatprep.subr.bf16.mxu1 %v2486_v0  ;;  %v2505_v0 = vld [vmem:[%s3266_s3 + $0x108] sm:$0xff]  }
  0x2f   :  { %2254 = vmatpush3.bf16.msra.mxu0 %v2479_v54 }
  0x30   :  { %2255 = vmatprep.subr.bf16.mxu0 %v2483_v58  ;;  %v2504_v58 = vld [vmem:[%s3266_s3 + $0x148] sm:$0xff]  }
  0x31   :  { %2232 = vmatpush3.bf16.msra.mxu1 %v2487_v3  ;;  %v2506_v3 = vld [vmem:[%s3266_s3 + $0x150] sm:$0xff]  }
  0x32   :  { %334 = vmatmul.mubr.bf16.gmra.mrb[8].mxu0 %v67_v38  ;;  %2233 = vmatprep.subr.bf16.mxu1 %v2488_v4 }
  0x33   :  { %341 = vmatprep.mubr.bf16.mxu0 %v72_v1  ;;  %2256 = vmatpush3.bf16.msra.mxu0 %v2485_v63 }
  0x34   :  { %2257 = vmatprep.subr.bf16.mxu0 %v2489_v6  ;;  %2429 = vmatmul.mubr.bf16.gmra.mrb[8].mxu1 %v79_v5 }
  0x35   :  { %2432 = vmatprep.mubr.bf16.mxu1 %v82_v7  ;;  %2234 = vmatpush3.bf16.msra.mxu1 %v2490_v8 }
  0x36   :  { %2235 = vmatprep.subr.bf16.mxu1 %v2492_v17  ;;  %v2510_v17 = vld [vmem:[%s3266_s3 + $0x158] sm:$0xff]  }
  0x37   :  { %2258 = vmatpush3.bf16.msra.mxu0 %v2491_v9 }
  0x38   :  { %2259 = vmatprep.subr.bf16.mxu0 %v2495_v23  ;;  %v2512_v23 = vld [vmem:[%s3266_s3 + $0x118] sm:$0xff]  }
  0x39   :  { %2236 = vmatpush3.bf16.msra.mxu1 %v2493_v18  ;;  %v2511_v18 = vld [vmem:[%s3266_s3 + $0x1c8] sm:$0xff]  }
  0x3a   :  { %342 = vmatmul.mubr.bf16.gmra.mrb[12].mxu0 %v2759_v40  ;;  %2237 = vmatprep.subr.bf16.mxu1 %v2494_v19 }
  0x3b   :  { %349 = vmatprep.mubr.bf16.mxu0 %v75_v12  ;;  %2260 = vmatpush3.bf16.msra.mxu0 %v2497_v24  ;;  %v2509_v12 = vld [vmem:[%s3266_s3 + $0x180] sm:$0xff]   ;;  %v2513_v24 = vld [vmem:[%s3266_s3 + $0x188] sm:$0xff]  }
  0x3c   :  { %2433 = vmatmul.mubr.bf16.gmra.mrb[12].mxu1 %v85_v13  ;;  %2261 = vmatprep.subr.bf16.mxu0 %v2500_v26 }
  0x3d   :  { %2238 = vmatpush3.bf16.msra.mxu1 %v2496_v20 }
  0x3e   :  { %2239 = vmatprep.subr.bf16.mxu1 %v2498_v21 }
  0x3f   :  { %2262 = vmatpush3.bf16.msra.mxu0 %v2502_v27  ;;  %v2514_v27 = vld [vmem:[%s3266_s3 + $0x160] sm:$0xff]  }
  0x40   :  { %2291 = vmatprep.subr.bf16.mxu0 %v2507_v28  ;;  %v2515_v28 = vld [vmem:[%s3266_s3 + $0x1d0] sm:$0xff]  }
  0x41   :  { %2240 = vmatpush3.bf16.msra.mxu1 %v2499_v22 }
  0x42   :  { %350 = vmatmul.mubr.bf16.gmra.mrb[16].mxu0 %v73_v53  ;;  %2269 = vmatprep.subr.bf16.mxu1 %v2501_v25 }
  0x43   :  { %357 = vmatprep.mubr.bf16.mxu0 %v78_v14 }
  0x4a   :  { %358 = vmatmul.mubr.bf16.gmra.mrb[20].mxu0 %v76_v56 }
  0x4b   :  { %365 = vmatprep.mubr.bf16.mxu0 %v81_v15 }
  0x52   :  { %366 = vmatmul.mubr.bf16.gmra.mrb[24].mxu0 %v79_v5 }
  0x53   :  { %373 = vmatprep.mubr.bf16.mxu0 %v84_v16 }
  0x5a   :  { %374 = vmatmul.mubr.bf16.gmra.mrb[28].mxu0 %v82_v7 }
  0xf5   :  { %v2161_v29 = vpop.f32.mrb[0].mxu0 }
  0xf6   :  { %v2162_v30 = vpop.f32.mrb[1].mxu0 }
  0xf7   :  { %v2163_v32 = vadd.f32 %v2162_v30, %v2161_v29  ;;  %v2164_v33 = vpop.f32.mrb[2].mxu0  ;;  %v2422_v35 = vpop.f32.mrb[0].mxu1 }
  0xf8   :  { %v2165_v34 = vpop.f32.mrb[3].mxu0  ;;  %v416_v38 = vpop.f32.mrb[1].mxu1 }
  0xf9   :  { %v2166_v36 = vadd.f32 %v2165_v34, %v2164_v33  ;;  %v320_v37 = vadd.f32 %v2163_v32, %v2898_v31  ;;  %v2423_v39 = vpop.f32.mrb[2].mxu1 }
  0xfa   :  { %v419_v42 = vpop.f32.mrb[3].mxu1 }
  0xfb   :  { %v417_v40 = vadd.f32 %v416_v38, %v320_v37  ;;  %v323_v41 = vadd.f32 %v2166_v36, %v2898_v31  ;;  %v2516_v36 = vld [vmem:[%s3266_s3 + $0x120] sm:$0xff]   ;;  %v2517_v37 = vld [vmem:[%s3266_s3 + $0x190] sm:$0xff]  }
  0xfd   :  { %v420_v43 = vadd.f32 %v419_v42, %v323_v41  ;;  %v2167_v44 = vpop.f32.mrb[4].mxu0  ;;  %v479_v45 = vmax.f32 %v417_v40, 0.0  ;;  %v2518_v42 = vld [vmem:[%s3266_s3 + $0x168] sm:$0xff]  }
  0xfe   :  { %v2168_v46 = vpop.f32.mrb[5].mxu0 }
  0xff   :  { %v480_v47 = vmax.f32 %v420_v43, 0.0  ;;  %v2169_v48 = vadd.f32 %v2168_v46, %v2167_v44  ;;  %v2170_v49 = vpop.f32.mrb[6].mxu0  ;;  %v2902_v51 = vpop.f32.mrb[4].mxu1  ;;  %v527_v57 = vpack.c.bf16 %v479_v45, %v479_v45  ;;  %v2519_v43 = vld [vmem:[%s3266_s3 + $0x1d8] sm:$0xff]  }
 0x100   :  { %v2171_v50 = vpop.f32.mrb[7].mxu0  ;;  %v432_v56 = vpop.f32.mrb[5].mxu1 }
 0x101   :  { %v528_v52 = vpack.c.bf16 %v480_v47, %v480_v47  ;;  %v328_v53 = vadd.f32 %v2169_v48, %v2898_v31  ;;  %v2172_v54 = vadd.f32 %v2171_v50, %v2170_v49  ;;  %v2911_v59 = vpop.f32.mrb[6].mxu1  ;;  %v2520_v48 = vld [vmem:[%s3266_s3 + $0x128] sm:$0xff]   ;;  %v2521_v49 = vld [vmem:[%s3266_s3 + $0x198] sm:$0xff]  }
 0x102   :  { %v435_v62 = vpop.f32.mrb[7].mxu1 }
 0x103   :  { %v425_v60 = vadd.f32 %v2422_v35, %v328_v53  ;;  %v331_v61 = vadd.f32 %v2172_v54, %v2898_v31  ;;  %1606 = vmatprep.mubr.bf16.mxu1 %v528_v52  ;;  %v2523_v53 = vld [vmem:[%s3266_s3 + $0x1e0] sm:$0xff]  }
 0x104   :  { %1607 = vmatmul.mubr.bf16.vlgmr.msra.gmra.mrb[16].mxu1 %v527_v57 }
 0x105   :  { %v428_v63 = vadd.f32 %v2423_v39, %v331_v61  ;;  %2270 = vmatpush3.bf16.msra.mxu1 %v2503_v55  ;;  %v2173_v1 = vpop.f32.mrb[8].mxu0  ;;  %v481_v2 = vmax.f32 %v425_v60, 0.0  ;;  %v2525_v60 = vld [vmem:[%s3266_s3 + $0x1a0] sm:$0xff]  }
 0x106   :  { %2271 = vmatprep.subr.bf16.mxu1 %v2504_v58  ;;  %v2174_v4 = vpop.f32.mrb[9].mxu0 }
 0x107   :  { %v482_v5 = vmax.f32 %v428_v63, 0.0  ;;  %v2175_v6 = vadd.f32 %v2174_v4, %v2173_v1  ;;  %v2176_v7 = vpop.f32.mrb[10].mxu0  ;;  %v2920_v9 = vpop.f32.mrb[8].mxu1  ;;  %v529_v16 = vpack.c.bf16 %v481_v2, %v481_v2  ;;  %v2527_v1 = vld [vmem:[%s3266_s3 + $0x1e8] sm:$0xff]   ;;  %v2528_v4 = vld [vmem:[%s3266_s3 + $0x138] sm:$0xff]  }
 0x108   :  { %v2177_v8 = vpop.f32.mrb[11].mxu0  ;;  %v2929_v15 = vpop.f32.mrb[9].mxu1 }
 0x109   :  { %2272 = vmatpush3.bf16.msra.mxu1 %v2505_v0  ;;  %v530_v10 = vpack.c.bf16 %v482_v5, %v482_v5  ;;  %v2178_v13 = vadd.f32 %v2177_v8, %v2176_v7  ;;  %v336_v14 = vadd.f32 %v2175_v6, %v2898_v31  ;;  %v2937_v19 = vpop.f32.mrb[10].mxu1  ;;  %v2526_v0 = vld [vmem:[%s3266_s3 + $0x178] sm:$0xff]   ;;  %v2529_v5 = vld [vmem:[%s3266_s3 + $0x1a8] sm:$0xff]  }
 0x10a   :  { %2273 = vmatprep.subr.bf16.mxu1 %v2506_v3  ;;  %v2942_v22 = vpop.f32.mrb[11].mxu1 }
 0x10b   :  { %1646 = vmatprep.mubr.bf16.mxu0 %v530_v10  ;;  %v2939_v20 = vadd.f32 %v432_v56, %v336_v14  ;;  %v339_v21 = vadd.f32 %v2178_v13, %v2898_v31  ;;  %v2530_v10 = vld [vmem:[%s3266_s3 + $0x1f0] sm:$0xff]  }
 0x10c   :  { %1647 = vmatmul.mubr.bf16.vlgmr.msra.gmra.mrb[32].mxu0 %v529_v16 }
 0x10d   :  { %2274 = vmatpush3.bf16.msra.mxu1 %v2508_v11  ;;  %2292 = vmatpush3.bf16.msra.mxu0 %v2509_v12  ;;  %v2179_v25 = vpop.f32.mrb[12].mxu0  ;;  %v436_v26 = vadd.f32 %v435_v62, %v339_v21  ;;  %v483_v8 = vmax.f32 %v2939_v20, 0.0  ;;  %v2531_v11 = vld [vmem:[%s3266_s3 + $0x240] sm:$0xff]  }
 0x10e   :  { %2275 = vmatprep.subr.bf16.mxu1 %v2510_v17  ;;  %2293 = vmatprep.subr.bf16.mxu0 %v2511_v18  ;;  %v2180_v29 = vpop.f32.mrb[13].mxu0  ;;  %v2532_v17 = vld [vmem:[%s3266_s3 + $0x1b0] sm:$0xff]   ;;  %v2533_v18 = vld [vmem:[%s3266_s3 + $0x200] sm:$0xff]  }
 0x10f   :  { %v2181_v30 = vadd.f32 %v2180_v29, %v2179_v25  ;;  %v484_v32 = vmax.f32 %v436_v26, 0.0  ;;  %v2182_v33 = vpop.f32.mrb[14].mxu0  ;;  %v2956_v35 = vpop.f32.mrb[12].mxu1  ;;  %v2537_v29 = vld [vmem:[%s3266_s3 + $0x208] sm:$0xff]  }
 0x110   :  { %v2183_v34 = vpop.f32.mrb[15].mxu0  ;;  %v2965_v41 = vpop.f32.mrb[13].mxu1 }
 0x111   :  { %2276 = vmatpush3.bf16.msra.mxu1 %v2512_v23  ;;  %2294 = vmatpush3.bf16.msra.mxu0 %v2513_v24  ;;  %v344_v38 = vadd.f32 %v2181_v30, %v2898_v31  ;;  %v532_v39 = vpack.c.bf16 %v484_v32, %v484_v32  ;;  %v2184_v40 = vadd.f32 %v2183_v34, %v2182_v33  ;;  %v2973_v44 = vpop.f32.mrb[14].mxu1  ;;  %v2534_v23 = vld [vmem:[%s3266_s3 + $0x1f8] sm:$0xff]   ;;  %v2535_v24 = vld [vmem:[%s3266_s3 + $0x248] sm:$0xff]   ;;  %v2538_v33 = vld [vmem:[%s3266_s3 + $0x250] sm:$0xff]  }
 0x112   :  { %2277 = vmatprep.subr.bf16.mxu1 %v2514_v27  ;;  %2295 = vmatprep.subr.bf16.mxu0 %v2515_v28  ;;  %v2979_v47 = vpop.f32.mrb[15].mxu1  ;;  %v2536_v28 = vld [vmem:[%s3266_s3 + $0x1b8] sm:$0xff]   ;;  %v2539_v34 = vld [vmem:[%s3266_s3 + $0x2c0] sm:$0xff]  }
 0x113   :  { %v2976_v45 = vadd.f32 %v2902_v51, %v344_v38  ;;  %v347_v46 = vadd.f32 %v2184_v40, %v2898_v31  ;;  %1686 = vmatprep.mubr.bf16.mxu1 %v532_v39  ;;  %v2522_v51 = vld [vmem:[%s3266_s3 + $0x170] sm:$0xff]  }
 0x115   :  { %2278 = vmatpush3.bf16.msra.mxu1 %v2516_v36  ;;  %2296 = vmatpush3.bf16.msra.mxu0 %v2517_v37  ;;  %v444_v50 = vadd.f32 %v2911_v59, %v347_v46  ;;  %v2185_v52 = vpop.f32.mrb[16].mxu0  ;;  %v2524_v59 = vld [vmem:[%s3266_s3 + $0x130] sm:$0xff]  }
 0x116   :  { %2279 = vmatprep.subr.bf16.mxu1 %v2518_v42  ;;  %2297 = vmatprep.subr.bf16.mxu0 %v2519_v43  ;;  %v2186_v54 = vpop.f32.mrb[17].mxu0  ;;  %v2541_v42 = vld [vmem:[%s3266_s3 + $0x280] sm:$0xff]  }
 0x117   :  { %v486_v55 = vmax.f32 %v444_v50, 0.0  ;;  %v2187_v56 = vadd.f32 %v2186_v54, %v2185_v52  ;;  %v2188_v57 = vpop.f32.mrb[18].mxu0  ;;  %v2545_v54 = vld [vmem:[%s3266_s3 + $0x288] sm:$0xff]  }
 0x118   :  { %v2189_v58 = vpop.f32.mrb[19].mxu0 }
 0x119   :  { %2280 = vmatpush3.bf16.msra.mxu1 %v2520_v48  ;;  %2298 = vmatpush3.bf16.msra.mxu0 %v2521_v49  ;;  %v534_v61 = vpack.c.bf16 %v486_v55, %v486_v55  ;;  %v2190_v62 = vadd.f32 %v2189_v58, %v2188_v57  ;;  %v352_v63 = vadd.f32 %v2187_v56, %v2898_v31  ;;  %v2542_v48 = vld [vmem:[%s3266_s3 + $0x258] sm:$0xff]   ;;  %v2543_v49 = vld [vmem:[%s3266_s3 + $0x2c8] sm:$0xff]   ;;  %v2547_v57 = vld [vmem:[%s3266_s3 + $0x2d0] sm:$0xff]  }
 0x11a   :  { %2281 = vmatprep.subr.bf16.mxu1 %v2522_v51  ;;  %2299 = vmatprep.subr.bf16.mxu0 %v2523_v53  ;;  %v2544_v53 = vld [vmem:[%s3266_s3 + $0x218] sm:$0xff]  }
 0x11b   :  { %1726 = vmatprep.mubr.bf16.mxu0 %v534_v61  ;;  %v3008_v2 = vadd.f32 %v2929_v15, %v352_v63  ;;  %v355_v3 = vadd.f32 %v2190_v62, %v2898_v31  ;;  %v2549_v62 = vld [vmem:[%s3266_s3 + $0x290] sm:$0xff]  }
 0x11d   :  { %2282 = vmatpush3.bf16.msra.mxu1 %v2524_v59  ;;  %2300 = vmatpush3.bf16.msra.mxu0 %v2525_v60  ;;  %v2191_v6 = vpop.f32.mrb[20].mxu0  ;;  %v452_v7 = vadd.f32 %v2942_v22, %v355_v3  ;;  %v531_v22 = vpack.c.bf16 %v483_v8, %v483_v8  ;;  %v2551_v3 = vld [vmem:[%s3266_s3 + $0x2d8] sm:$0xff]  }
 0x11e   :  { %2283 = vmatprep.subr.bf16.mxu1 %v2526_v0  ;;  %2301 = vmatprep.subr.bf16.mxu0 %v2527_v1  ;;  %v2192_v12 = vpop.f32.mrb[21].mxu0  ;;  %v2550_v1 = vld [vmem:[%s3266_s3 + $0x268] sm:$0xff]  }
 0x11f   :  { %v2193_v13 = vadd.f32 %v2192_v12, %v2191_v6  ;;  %v488_v14 = vmax.f32 %v452_v7, 0.0  ;;  %v2194_v15 = vpop.f32.mrb[22].mxu0  ;;  %v2552_v6 = vld [vmem:[%s3266_s3 + $0x228] sm:$0xff]   ;;  %v2553_v7 = vld [vmem:[%s3266_s3 + $0x298] sm:$0xff]  }
 0x120   :  { %v2195_v16 = vpop.f32.mrb[23].mxu0  ;;  %v2559_v12 = vld [vmem:[%s3266_s3 + $0x2e8] sm:$0xff]  }
 0x121   :  { %2284 = vmatpush3.bf16.msra.mxu1 %v2528_v4  ;;  %2302 = vmatpush3.bf16.msra.mxu0 %v2529_v5  ;;  %v360_v20 = vadd.f32 %v2193_v13, %v2898_v31  ;;  %v2196_v21 = vadd.f32 %v2195_v16, %v2194_v15  ;;  %v536_v26 = vpack.c.bf16 %v488_v14, %v488_v14  ;;  %v2560_v13 = vld [vmem:[%s3266_s3 + $0x238] sm:$0xff]   ;;  %v2561_v14 = vld [vmem:[%s3266_s3 + $0x2a8] sm:$0xff]   ;;  %v487_v15 = vmax.f32 %v3008_v2, 0.0  ;;  %v2562_v16 = vld [vmem:[%s3266_s3 + $0x2f0] sm:$0xff]  }
 0x122   :  { %2303 = vmatprep.subr.bf16.mxu0 %v2530_v10  ;;  %2313 = vmatprep.subr.bf16.mxu1 %v2531_v11  ;;  %v2556_v10 = vld [vmem:[%s3266_s3 + $0x230] sm:$0xff]   ;;  %v2558_v11 = vld [vmem:[%s3266_s3 + $0x278] sm:$0xff]   ;;  %v2565_v2 = vld [vmem:[%s3266_s3 + $0x300] sm:$0xff]  }
 0x123   :  { %v3039_v25 = vadd.f32 %v2920_v9, %v360_v20  ;;  %v363_v27 = vadd.f32 %v2196_v21, %v2898_v31  ;;  %v485_v9 = vmax.f32 %v2976_v45, 0.0  ;;  %v2564_v20 = vld [vmem:[%s3266_s3 + $0x2b0] sm:$0xff]   ;;  %v535_v21 = vpack.c.bf16 %v487_v15, %v487_v15 }
 0x124   :  { %1687 = vmatmul.mubr.bf16.vlgmr.msra.gmra.mrb[20].mxu1 %v531_v22  ;;  %v2566_v22 = vld [vmem:[%s3266_s3 + $0x2f8] sm:$0xff]  }
 0x125   :  { %2304 = vmatpush3.bf16.msra.mxu0 %v2532_v17  ;;  %2314 = vmatpush3.bf16.msra.mxu1 %v2533_v18  ;;  %v460_v30 = vadd.f32 %v2937_v19, %v363_v27  ;;  %v2197_v32 = vpop.f32.mrb[24].mxu0  ;;  %v2540_v19 = vld [vmem:[%s3266_s3 + $0x210] sm:$0xff]   ;;  %v533_v46 = vpack.c.bf16 %v485_v9, %v485_v9  ;;  %v2563_v17 = vld [vmem:[%s3266_s3 + $0x340] sm:$0xff]   ;;  %v2569_v27 = vld [vmem:[%s3266_s3 + $0x308] sm:$0xff]  }
 0x126   :  { %2305 = vmatprep.subr.bf16.mxu0 %v2534_v23  ;;  %2315 = vmatprep.subr.bf16.mxu1 %v2535_v24  ;;  %v2198_v36 = vpop.f32.mrb[25].mxu0  ;;  %v2567_v23 = vld [vmem:[%s3266_s3 + $0x348] sm:$0xff]   ;;  %v2572_v9 = vld [vmem:[%s3266_s3 + $0x310] sm:$0xff]  }
 0x127   :  { %1766 = vmatprep.mubr.bf16.mxu1 %v536_v26  ;;  %v490_v37 = vmax.f32 %v460_v30, 0.0  ;;  %v2199_v38 = vadd.f32 %v2198_v36, %v2197_v32  ;;  %v2200_v39 = vpop.f32.mrb[26].mxu0  ;;  %v2568_v26 = vld [vmem:[%s3266_s3 + $0x2b8] sm:$0xff]   ;;  %v2571_v30 = vld [vmem:[%s3266_s3 + $0x3c0] sm:$0xff]   ;;  %v2575_v36 = vld [vmem:[%s3266_s3 + $0x3c8] sm:$0xff]  }
 0x128   :  { %v2201_v40 = vpop.f32.mrb[27].mxu0 }
 0x129   :  { %2306 = vmatpush3.bf16.msra.mxu0 %v2536_v28  ;;  %2316 = vmatpush3.bf16.msra.mxu1 %v2537_v29  ;;  %v2202_v43 = vadd.f32 %v2201_v40, %v2200_v39  ;;  %v368_v45 = vadd.f32 %v2199_v38, %v2898_v31  ;;  %v538_v50 = vpack.c.bf16 %v490_v37, %v490_v37  ;;  %v489_v28 = vmax.f32 %v3039_v25, 0.0  ;;  %v2570_v29 = vld [vmem:[%s3266_s3 + $0x350] sm:$0xff]   ;;  %v2573_v25 = vld [vmem:[%s3266_s3 + $0x380] sm:$0xff]   ;;  %v2576_v38 = vld [vmem:[%s3266_s3 + $0x318] sm:$0xff]  }
 0x12a   :  { %2317 = vmatprep.subr.bf16.mxu1 %v2538_v33  ;;  %2335 = vmatprep.subr.bf16.mxu0 %v2539_v34  ;;  %v2574_v34 = vld [vmem:[%s3266_s3 + $0x358] sm:$0xff]   ;;  %v2577_v39 = vld [vmem:[%s3266_s3 + $0x388] sm:$0xff]   ;;  %v2578_v40 = vld [vmem:[%s3266_s3 + $0x360] sm:$0xff]  }
 0x12b   :  { %v3070_v52 = vadd.f32 %v2965_v41, %v368_v45  ;;  %v371_v51 = vadd.f32 %v2202_v43, %v2898_v31  ;;  %v2546_v41 = vld [vmem:[%s3266_s3 + $0x260] sm:$0xff]   ;;  %v537_v33 = vpack.c.bf16 %v489_v28, %v489_v28  ;;  %v2581_v43 = vld [vmem:[%s3266_s3 + $0x390] sm:$0xff]   ;;  %v2582_v45 = vld [vmem:[%s3266_s3 + $0x368] sm:$0xff]  }
 0x12c   :  { %1727 = vmatmul.mubr.bf16.vlgmr.msra.gmra.mrb[36].mxu0 %v533_v46  ;;  %v2583_v46 = vld [vmem:[%s3266_s3 + $0x3d8] sm:$0xff]  }
 0x12d   :  { %2318 = vmatpush3.bf16.msra.mxu1 %v2540_v19  ;;  %2336 = vmatpush3.bf16.msra.mxu0 %v2541_v42  ;;  %v2203_v55 = vpop.f32.mrb[28].mxu0  ;;  %v468_v56 = vadd.f32 %v2979_v47, %v371_v51  ;;  %v2548_v47 = vld [vmem:[%s3266_s3 + $0x220] sm:$0xff]   ;;  %v2579_v19 = vld [vmem:[%s3266_s3 + $0x3d0] sm:$0xff]  }
 0x12e   :  { %2319 = vmatprep.subr.bf16.mxu1 %v2542_v48  ;;  %2337 = vmatprep.subr.bf16.mxu0 %v2543_v49  ;;  %v2204_v58 = vpop.f32.mrb[29].mxu0  ;;  %v2580_v42 = vld [vmem:[%s3266_s3 + $0x320] sm:$0xff]   ;;  %v2584_v48 = vld [vmem:[%s3266_s3 + $0x328] sm:$0xff]   ;;  %v2585_v49 = vld [vmem:[%s3266_s3 + $0x398] sm:$0xff]  }
 0x12f   :  { %1806 = vmatprep.mubr.bf16.mxu0 %v538_v50  ;;  %v2205_v59 = vadd.f32 %v2204_v58, %v2203_v55  ;;  %v2206_v60 = vpop.f32.mrb[30].mxu0  ;;  %v492_v18 = vmax.f32 %v468_v56, 0.0  ;;  %v2586_v50 = vld [vmem:[%s3266_s3 + $0x370] sm:$0xff]   ;;  %v2587_v51 = vld [vmem:[%s3266_s3 + $0x3e0] sm:$0xff]   ;;  %v2590_v55 = vld [vmem:[%s3266_s3 + $0x378] sm:$0xff]   ;;  %v491_v58 = vmax.f32 %v3070_v52, 0.0 }
 0x130   :  { %v2207_v61 = vpop.f32.mrb[31].mxu0  ;;  %v2591_v56 = vld [vmem:[%s3266_s3 + $0x3e8] sm:$0xff]   ;;  %v2597_v52 = vld [vmem:[%s3266_s3 + $0x3b8] sm:$0xff]  }
 0x131   :  { %2320 = vmatpush3.bf16.msra.mxu1 %v2544_v53  ;;  %2338 = vmatpush3.bf16.msra.mxu0 %v2545_v54  ;;  %v376_v63 = vadd.f32 %v2205_v59, %v2898_v31  ;;  %v2208_v0 = vadd.f32 %v2207_v61, %v2206_v60  ;;  %v540_v24 = vpack.c.bf16 %v492_v18, %v492_v18  ;;  %v2588_v53 = vld [vmem:[%s3266_s3 + $0x330] sm:$0xff]   ;;  %v2589_v54 = vld [vmem:[%s3266_s3 + $0x3a0] sm:$0xff]  }
 0x132   :  { %2321 = vmatprep.subr.bf16.mxu1 %v2546_v41  ;;  %2339 = vmatprep.subr.bf16.mxu0 %v2547_v57  ;;  %v2592_v41 = vld [vmem:[%s3266_s3 + $0x338] sm:$0xff]   ;;  %v2593_v57 = vld [vmem:[%s3266_s3 + $0x3a8] sm:$0xff]   ;;  %v2594_v59 = vld [vmem:[%s3266_s3 + $0x3f0] sm:$0xff]   ;;  %v539_v61 = vpack.c.bf16 %v491_v58, %v491_v58 }
 0x133   :  { %v3100_v4 = vadd.f32 %v2956_v35, %v376_v63  ;;  %v379_v5 = vadd.f32 %v2208_v0, %v2898_v31  ;;  %v2554_v35 = vld [vmem:[%s3266_s3 + $0x270] sm:$0xff]   ;;  %v2555_v31 = vld [vmem:[%s3266_s3 + $0x2e0] sm:$0xff]  }
 0x134   :  { %v2595_v60 = vld [vmem:[%s3266_s3 + $0x3b0] sm:$0xff]   ;;  %v2598_v0 = vld [vmem:[%s3268_s5] sm:$0xff]  }
 0x135   :  { %2322 = vmatpush3.bf16.msra.mxu1 %v2548_v47  ;;  %2340 = vmatpush3.bf16.msra.mxu0 %v2549_v62  ;;  %v476_v8 = vadd.f32 %v2973_v44, %v379_v5  ;;  %v2557_v44 = vld [vmem:[%s3266_s3 + $0x2a0] sm:$0xff]   ;;  %v2596_v47 = vld [vmem:[%s3266_s3 + $0x3f8] sm:$0xff]   ;;  %v493_v62 = vmax.f32 %v3100_v4, 0.0 }
 0x136   :  { %2323 = vmatprep.subr.bf16.mxu1 %v2550_v1  ;;  %2341 = vmatprep.subr.bf16.mxu0 %v2551_v3  ;;  %v2604_v1 = vmov 0.0   ;;  %v2599_v3 = vld [vmem:[%s3268_s5 + $0x8] sm:$0xff]   ;;  %v2141_v58 = vld [vmem:[%s3270_s6] ss:$0 sm:$0xff] }
 0x137   :  { %v494_v32 = vmax.f32 %v476_v8, 0.0  ;;  %v541_v63 = vpack.c.bf16 %v493_v62, %v493_v62 }
 0x139   :  { %2324 = vmatpush3.bf16.msra.mxu1 %v2552_v6  ;;  %2342 = vmatpush3.bf16.msra.mxu0 %v2553_v7  ;;  %v542_v37 = vpack.c.bf16 %v494_v32, %v494_v32 }
 0x13a   :  { %2325 = vmatprep.subr.bf16.mxu1 %v2554_v35  ;;  %2343 = vmatprep.subr.bf16.mxu0 %v2555_v31  ;;  %v2012_v35 = vld [vmem:[%s3269_s4] ss:$0 sm:$0xff] }
 0x13d   :  { %2326 = vmatpush3.bf16.msra.mxu1 %v2556_v10  ;;  %2344 = vmatpush3.bf16.msra.mxu0 %v2557_v44 }
 0x13e   :  { %2327 = vmatprep.subr.bf16.mxu1 %v2558_v11  ;;  %2345 = vmatprep.subr.bf16.mxu0 %v2559_v12 }
 0x141   :  { %2328 = vmatpush3.bf16.msra.mxu1 %v2560_v13  ;;  %2346 = vmatpush3.bf16.msra.mxu0 %v2561_v14 }
 0x142   :  { %2347 = vmatprep.subr.bf16.mxu0 %v2562_v16  ;;  %2357 = vmatprep.subr.bf16.mxu1 %v2563_v17 }
 0x144   :  { %1767 = vmatmul.mubr.bf16.vlgmr.msra.gmra.mrb[24].mxu1 %v535_v21 }
 0x145   :  { %2348 = vmatpush3.bf16.msra.mxu0 %v2564_v20  ;;  %2358 = vmatpush3.bf16.msra.mxu1 %v2565_v2 }
 0x146   :  { %2349 = vmatprep.subr.bf16.mxu0 %v2566_v22  ;;  %2359 = vmatprep.subr.bf16.mxu1 %v2567_v23 }
 0x147   :  { %1846 = vmatprep.mubr.bf16.mxu1 %v540_v24 }
 0x149   :  { %2350 = vmatpush3.bf16.msra.mxu0 %v2568_v26  ;;  %2360 = vmatpush3.bf16.msra.mxu1 %v2569_v27 }
 0x14a   :  { %2361 = vmatprep.subr.bf16.mxu1 %v2570_v29  ;;  %2379 = vmatprep.subr.bf16.mxu0 %v2571_v30 }
 0x14c   :  { %1807 = vmatmul.mubr.bf16.vlgmr.msra.gmra.mrb[40].mxu0 %v537_v33 }
 0x14d   :  { %2362 = vmatpush3.bf16.msra.mxu1 %v2572_v9  ;;  %2380 = vmatpush3.bf16.msra.mxu0 %v2573_v25 }
 0x14e   :  { %2363 = vmatprep.subr.bf16.mxu1 %v2574_v34  ;;  %2381 = vmatprep.subr.bf16.mxu0 %v2575_v36 }
 0x14f   :  { %1886 = vmatprep.mubr.bf16.mxu0 %v542_v37 }
 0x151   :  { %2364 = vmatpush3.bf16.msra.mxu1 %v2576_v38  ;;  %2382 = vmatpush3.bf16.msra.mxu0 %v2577_v39 }
 0x152   :  { %2365 = vmatprep.subr.bf16.mxu1 %v2578_v40  ;;  %2383 = vmatprep.subr.bf16.mxu0 %v2579_v19 }
 0x155   :  { %2366 = vmatpush3.bf16.msra.mxu1 %v2580_v42  ;;  %2384 = vmatpush3.bf16.msra.mxu0 %v2581_v43 }
 0x156   :  { %2367 = vmatprep.subr.bf16.mxu1 %v2582_v45  ;;  %2385 = vmatprep.subr.bf16.mxu0 %v2583_v46 }
 0x159   :  { %2368 = vmatpush3.bf16.msra.mxu1 %v2584_v48  ;;  %2386 = vmatpush3.bf16.msra.mxu0 %v2585_v49 }
 0x15a   :  { %2369 = vmatprep.subr.bf16.mxu1 %v2586_v50  ;;  %2387 = vmatprep.subr.bf16.mxu0 %v2587_v51 }
 0x15d   :  { %2370 = vmatpush3.bf16.msra.mxu1 %v2588_v53  ;;  %2388 = vmatpush3.bf16.msra.mxu0 %v2589_v54 }
 0x15e   :  { %2371 = vmatprep.subr.bf16.mxu1 %v2590_v55  ;;  %2389 = vmatprep.subr.bf16.mxu0 %v2591_v56 }
 0x161   :  { %2372 = vmatpush3.bf16.msra.mxu1 %v2592_v41  ;;  %2390 = vmatpush3.bf16.msra.mxu0 %v2593_v57  ;;  %v1964_v41 = vlaneseq }
 0x162   :  { %2391 = vmatprep.subr.bf16.mxu0 %v2594_v59  ;;  %2436 = vmatprep.subr.bf16.mxu1 %v2604_v1 }
 0x163   :  { %v1965_v57 = vand.u32 127, %v1964_v41 }
 0x164   :  { %1847 = vmatmul.mubr.bf16.vlgmr.msra.gmra.mrb[28].mxu1 %v539_v61 }
 0x165   :  { %2392 = vmatpush3.bf16.msra.mxu0 %v2595_v60  ;;  %2437 = vmatpush3.bf16.msra.mxu1 %v2598_v0  ;;  %vm1966_vm2 = vcmp.lt.s32.totalorder %v1965_v57, 6 }
 0x166   :  { %2393 = vmatprep.subr.bf16.mxu0 %v2596_v47  ;;  %2438 = vmatprep.subr.bf16.mxu1 %v2604_v1 }
 0x167   :  { %2440 = vmatprep.mubr.msk.bf16.mxu1 %vm2605_vm0, %v2604_v1 }
 0x169   :  { %2394 = vmatpush3.bf16.msra.mxu0 %v2597_v52  ;;  %2439 = vmatpush3.bf16.msra.mxu1 %v2599_v3 }
 0x16c   :  { %1887 = vmatmul.mubr.bf16.vlgmr.msra.gmra.mrb[44].mxu0 %v541_v63 }
 0x1d7   :  { %v2241_v4 = vpop.f32.mrb[16].mxu1 }
 0x1d8   :  { %v2242_v5 = vpop.f32.mrb[17].mxu1 }
 0x1d9   :  { %v2243_v6 = vadd.f32 %v2242_v5, %v2241_v4  ;;  %v2244_v7 = vpop.f32.mrb[18].mxu1 }
 0x1da   :  { %v2245_v8 = vpop.f32.mrb[19].mxu1 }
 0x1db   :  { %v1609_v44 = vadd.f32 %v2243_v6, %v2012_v35 }
 0x1df   :  { %v2263_v31 = vpop.f32.mrb[32].mxu0 }
 0x1e0   :  { %v2264_v10 = vpop.f32.mrb[33].mxu0 }
 0x1e1   :  { %v2265_v11 = vadd.f32 %v2264_v10, %v2263_v31  ;;  %v2266_v12 = vpop.f32.mrb[34].mxu0 }
 0x1e2   :  { %v2267_v13 = vpop.f32.mrb[35].mxu0 }
 0x1e3   :  { %v1649_v14 = vadd.f32 %v2265_v11, %v1609_v44 }
 0x1f7   :  { %v2285_v15 = vpop.f32.mrb[20].mxu1 }
 0x1f8   :  { %v2286_v16 = vpop.f32.mrb[21].mxu1 }
 0x1f9   :  { %v2287_v17 = vadd.f32 %v2286_v16, %v2285_v15  ;;  %v2288_v18 = vpop.f32.mrb[22].mxu1 }
 0x1fa   :  { %v2289_v20 = vpop.f32.mrb[23].mxu1 }
 0x1fb   :  { %v1689_v2 = vadd.f32 %v2287_v17, %v1649_v14 }
 0x1ff   :  { %v2307_v21 = vpop.f32.mrb[36].mxu0 }
 0x200   :  { %v2308_v22 = vpop.f32.mrb[37].mxu0 }
 0x201   :  { %v2309_v23 = vadd.f32 %v2308_v22, %v2307_v21  ;;  %v2310_v24 = vpop.f32.mrb[38].mxu0 }
 0x202   :  { %v2311_v26 = vpop.f32.mrb[39].mxu0 }
 0x203   :  { %v1729_v27 = vadd.f32 %v2309_v23, %v1689_v2 }
 0x217   :  { %v2329_v28 = vpop.f32.mrb[24].mxu1 }
 0x218   :  { %v2330_v29 = vpop.f32.mrb[25].mxu1 }
 0x219   :  { %v2331_v30 = vadd.f32 %v2330_v29, %v2329_v28  ;;  %v2332_v32 = vpop.f32.mrb[26].mxu1 }
 0x21a   :  { %v2333_v9 = vpop.f32.mrb[27].mxu1 }
 0x21b   :  { %v1769_v25 = vadd.f32 %v2331_v30, %v1729_v27 }
 0x21f   :  { %v2351_v33 = vpop.f32.mrb[40].mxu0 }
 0x220   :  { %v2352_v34 = vpop.f32.mrb[41].mxu0 }
 0x221   :  { %v2353_v36 = vadd.f32 %v2352_v34, %v2351_v33  ;;  %v2354_v37 = vpop.f32.mrb[42].mxu0 }
 0x222   :  { %v2355_v38 = vpop.f32.mrb[43].mxu0 }
 0x223   :  { %v1809_v39 = vadd.f32 %v2353_v36, %v1769_v25 }
 0x237   :  { %v2373_v40 = vpop.f32.mrb[28].mxu1 }
 0x238   :  { %v2374_v19 = vpop.f32.mrb[29].mxu1 }
 0x239   :  { %v2375_v42 = vadd.f32 %v2374_v19, %v2373_v40  ;;  %v2376_v43 = vpop.f32.mrb[30].mxu1 }
 0x23a   :  { %v2377_v45 = vpop.f32.mrb[31].mxu1 }
 0x23b   :  { %v1849_v46 = vadd.f32 %v2375_v42, %v1809_v39 }
 0x23f   :  { %v2395_v48 = vpop.f32.mrb[44].mxu0 }
 0x240   :  { %v2396_v49 = vpop.f32.mrb[45].mxu0 }
 0x241   :  { %v2397_v50 = vadd.f32 %v2396_v49, %v2395_v48  ;;  %v2398_v51 = vpop.f32.mrb[46].mxu0 }
 0x242   :  { %v2399_v53 = vpop.f32.mrb[47].mxu0 }
 0x243   :  { %v1889_v54 = vadd.f32 %v2397_v50, %v1849_v46 }
 0x245   :  { %v1894_v55 = vmax.f32 %v1889_v54, 0.0 }
 0x247   :  { %v1895_v56 = vpack.c.bf16 %v1894_v55, %v1894_v55 }
 0x249   :  { %2441 = vmatmul.mubr.msk.bf16.vlgmr.msra.gmra.mrb[32].mxu1 %vm1919_vm1, %v1895_v56 }
 0x31c   :  { %v1957_v59 = vpop.f32.mrb[32].mxu1 }
 0x31d   :  { %v1958_v60 = vadd.f32 %v2141_v58, %v1957_v59  ;;  %v2442_v61 = vpop.f32.mrb[33].mxu1 }
 0x31e   :  { %v1960_v47 = vpop.f32.mrb[34].mxu1 }
 0x31f   :  { %1963 = vst [vmem:[%s3271_s7] sm:$0xff] %v1958_v60  ;;  %v2443_v52 = vpop.f32.mrb[35].mxu1  ;;  %v1967_v62 = vsel %vm1966_vm2, %v1958_v60, -1e+30 }
 0x320   :  { %1968 = vmax.xlane.f32.xlu0 %v1967_v62 }
 0x3ad   :  { %v1969_v63 = vpop.xlane.xlu0 %1968 }
 0x3ae   :  { %v1970_v0 = vsub.f32 %v1967_v62, %v1969_v63 }
 0x3b0   :  { %v1971_v1 = vmul.f32 1.442695, %v1970_v0 }
 0x3b2   :  { %2600 = vpow2.f32 %v1971_v1 }
 0x3bc   :  { %v2601_v3 = vpop.eup %2600 }
 0x3bd   :  { %1973 = vadd.xlane.f32.xlu0 %v2601_v3 }
 0x44a   :  { %v1974_v4 = vpop.xlane.xlu0 %1973 }
 0x44b   :  { %2602 = vlog2.f32 %v1974_v4 }
 0x455   :  { %v2603_v5 = vpop.eup %2602 }
 0x456   :  { %v1976_v6 = vmul.f32 0.6931472, %v2603_v5 }
 0x458   :  { %v1977_v7 = vsub.f32 %v1970_v0, %v1976_v6 }
 0x45a   :  { %1978 = vst [vmem:[%s3272_s8] sm:$0xff] %v1977_v7 }

</bundles_post_ra>
